<compile_context>
chip_gen: v6e
topology: v6e:2x2x1
jax: 0.10.0
libtpu: 0.0.40
codegen_flags: <defaults>
</compile_context>

<pallas_src>
import functools

import jax
import jax.numpy as jnp
from jax.experimental import pallas as pl
from jax.experimental.pallas import tpu as pltpu


def _round_up(x, m):
    return ((x + m - 1) // m) * m


# -----------------------------------------------------------------------------
# Pallas kernel: merged one-hot MXU gather + MXU reductions + contrastive loss
# -----------------------------------------------------------------------------
def _pair_loss_kernel(margin_ref, tab_ref, idx_ref, out_ref, acc_ref, *, d_emb):
    t = pl.program_id(1)                 # pair tile within the core-half
    n_t = pl.num_programs(1)

    @pl.when(t == 0)
    def _():
        acc_ref[...] = jnp.zeros_like(acc_ref)

    tab = tab_ref[...]                   # (d_pad, n_pad)  node axis on lanes
    idx = idx_ref[...]                   # (1, 2*tile) int32, layout [i | j]
    d_pad, n_pad = tab.shape
    two_tile = idx.shape[1]
    tile = two_tile // 2

    # Single merged one-hot gather for both pair endpoints (one MXU matmul):
    # onehot[n, p] = (idx[p] == n);  g = table @ onehot  ->  (d_pad, 2*tile).
    node = jax.lax.broadcasted_iota(jnp.int32, (n_pad, two_tile), 0)
    onehot = jnp.where(node == idx, 1.0, 0.0).astype(tab.dtype)
    g = jnp.dot(tab, onehot, preferred_element_type=jnp.float32)

    # Elementwise products of the i-half and j-half (128-aligned lane halves).
    prod = g[:, :tile] * g[:, tile:]     # (d_pad, tile) f32

    # D-axis reductions on the MXU instead of VPU/XLU sublane sums:
    #   cos  = sum over embedding rows  [0, d_emb)
    #   post = sum over posterior rows  [d_emb, d_emb + 2)
    col = jax.lax.broadcasted_iota(jnp.int32, (1, d_pad), 1)
    sel_cos = (col < d_emb).astype(jnp.float32)                        # (1, d_pad)
    sel_post = ((col >= d_emb) & (col < d_emb + 2)).astype(jnp.float32)
    cos = jnp.dot(sel_cos, prod, preferred_element_type=jnp.float32)   # (1, tile)
    post = jnp.dot(sel_post, prod, preferred_element_type=jnp.float32) # (1, tile)

    # softplus(raw_margin) precomputed in the wrapper (scalar, SMEM).
    eff_margin = margin_ref[0]
    pos_loss = (cos - 1.0) ** 2
    neg_loss = jnp.maximum(cos - eff_margin, 0.0) ** 2
    # Sentinel-padded pairs have cos = post = 0 and eff_margin > 0, so they
    # contribute exactly 0 — no per-step validity mask needed.
    acc_ref[...] += pos_loss * post + neg_loss * (1.0 - post)

    # Collapse the lane-dense partial to a scalar once per core-half.
    @pl.when(t == n_t - 1)
    def _():
        out_ref[...] = jnp.reshape(
            jnp.sum(acc_ref[...], axis=1, keepdims=True), (1, 1, 1))


# -----------------------------------------------------------------------------
# Wrapper: normalization / softplus / table packing in JAX, loss in-kernel
# -----------------------------------------------------------------------------
def contrastive_pair_loss(embeddings, E, idx_i, idx_j, raw_margin, *,
                          tile=2048, table_dtype=jnp.bfloat16):
    N, D = embeddings.shape
    P = int(idx_i.shape[0])
    itemsize = jnp.dtype(table_dtype).itemsize

    # Per-node L2 normalization once (N rows), not per sampled pair (2P rows).
    emb = embeddings.astype(jnp.float32)
    inv_norm = jax.lax.rsqrt(
        jnp.maximum(jnp.sum(emb * emb, axis=1, keepdims=True), 1e-24))
    ne = emb * inv_norm                                               # (N, D)

    # Folded node table (node axis on lanes):
    #   rows [0, D)      normalized embedding dims
    #   rows [D, D + 2)  posterior columns E[:, 0], E[:, 1]
    # plus an all-zero "sentinel" node column at index N used for pair padding.
    d_pad = _round_up(D + 2, 8)
    n_pad = _round_up(N + 1, 128)
    tab = jnp.zeros((d_pad, n_pad), jnp.float32)
    tab = tab.at[:D, :N].set(ne.T)
    tab = tab.at[D:D + 2, :N].set(E.astype(jnp.float32).T)
    tab = tab.astype(table_dtype)
    # TODO(synk): once (D + 2) * N * itemsize exceeds ~half the scoped VMEM,
    # switch from the resident one-hot gather to scalar-prefetched indices
    # (PrefetchScalarGridSpec) driving a manual make_async_copy row-gather
    # pipeline, or chunk the node axis and accumulate partial gathers.

    # Pair tile (lanes per endpoint): large default, clamped by the pair count
    # (pair axis is split in two across the parallel core axis) and by a
    # guardrail keeping the in-kernel (n_pad, 2*tile) one-hot under ~4 MiB.
    tile = max(128, min(int(tile), _round_up(max((P + 1) // 2, 1), 128)))
    onehot_cap = (4 << 20) // (n_pad * 2 * itemsize)
    tile = max(128, min(tile, (onehot_cap // 128) * 128))
    tile = _round_up(tile, 128)

    n_tiles = -(-P // tile)
    n_half = (n_tiles + 1) // 2          # pair tiles per core-half
    n_blocks = 2 * n_half
    P_pad = n_blocks * tile

    # Padded pairs point at the zero sentinel node -> contribute exactly 0.
    idx_i_p = jnp.full((P_pad,), N, jnp.int32).at[:P].set(idx_i.astype(jnp.int32))
    idx_j_p = jnp.full((P_pad,), N, jnp.int32).at[:P].set(idx_j.astype(jnp.int32))
    # Merged per-block layout: block t = [i_tile(t) | j_tile(t)]  of width 2*tile.
    idx_all = jnp.concatenate(
        [idx_i_p.reshape(n_blocks, tile), idx_j_p.reshape(n_blocks, tile)],
        axis=1).reshape(1, n_blocks * 2 * tile)

    # Hoisted scalar softplus (torch F.softplus default beta=1).
    eff_margin = jnp.reshape(
        jax.nn.softplus(jnp.asarray(raw_margin, jnp.float32)), (1,))

    # Explicit scoped-VMEM budget: resident table (double-buffered) + index
    # blocks + in-kernel one-hot / gather intermediates + headroom.
    table_bytes = d_pad * n_pad * itemsize
    idx_bytes = 2 * tile * 4
    onehot_bytes = n_pad * 2 * tile * itemsize
    gather_bytes = d_pad * 2 * tile * 4
    vmem_bytes = int(2 * table_bytes + 2 * idx_bytes
                     + 2 * (onehot_bytes + gather_bytes) + (8 << 20))
    vmem_bytes = min(max(vmem_bytes, 32 << 20), 64 << 20)

    kernel = functools.partial(_pair_loss_kernel, d_emb=D)
    partials = pl.pallas_call(
        kernel,
        out_shape=jax.ShapeDtypeStruct((2, 1, 1), jnp.float32),
        grid_spec=pltpu.PrefetchScalarGridSpec(
            num_scalar_prefetch=0,
            grid=(2, n_half),
            in_specs=[
                pl.BlockSpec(memory_space=pltpu.MemorySpace.SMEM),    # softplus(margin)
                pl.BlockSpec((d_pad, n_pad), lambda c, t: (0, 0)),    # folded table (resident)
                pl.BlockSpec((1, 2 * tile),
                             lambda c, t: (0, c * n_half + t)),       # merged [i|j] idx block
            ],
            out_specs=pl.BlockSpec((1, 1, 1), lambda c, t: (c, 0, 0)),
            scratch_shapes=[pltpu.VMEM((1, tile), jnp.float32)],
        ),
        compiler_params=pltpu.CompilerParams(
            dimension_semantics=("parallel", "arbitrary"),
            vmem_limit_bytes=vmem_bytes),
    )(eff_margin, tab, idx_all)

    return jnp.sum(partials) / jnp.float32(P)


# -----------------------------------------------------------------------------
# Posterior-based pair sampling (plain JAX; mirrors the torch sampling logic)
# -----------------------------------------------------------------------------
def sample_pairs(key, E, num_pairs, eps=1e-6):
    global_class_probs = E.mean(axis=0)                         # (2,)
    k_cls, k0, k1 = jax.random.split(key, 3)
    sampled_classes = jax.random.categorical(
        k_cls, jnp.log(global_class_probs), shape=(num_pairs,))
    logits0 = jnp.log(1.0 / (E[:, 0] + eps))
    logits1 = jnp.log(1.0 / (E[:, 1] + eps))
    pairs0 = jax.random.categorical(k0, logits0, shape=(num_pairs, 2))
    pairs1 = jax.random.categorical(k1, logits1, shape=(num_pairs, 2))
    pairs = jnp.where((sampled_classes == 0)[:, None], pairs0, pairs1)
    return pairs[:, 0].astype(jnp.int32), pairs[:, 1].astype(jnp.int32)


# -----------------------------------------------------------------------------
# Pure-JAX reference (same math as the torch forward, given sampled pairs)
# -----------------------------------------------------------------------------
def reference_loss(embeddings, E, idx_i, idx_j, raw_margin):
    norm = jnp.maximum(jnp.linalg.norm(embeddings, axis=1, keepdims=True), 1e-12)
    ne = embeddings / norm
    cos = jnp.sum(ne[idx_i] * ne[idx_j], axis=1)
    post = E[idx_i, 0] * E[idx_j, 0] + E[idx_i, 1] * E[idx_j, 1]
    eff = jnp.log1p(jnp.exp(raw_margin))
    pos = (cos - 1.0) ** 2
    neg = jnp.maximum(cos - eff, 0.0) ** 2
    return jnp.mean(pos * post + neg * (1.0 - post))


if __name__ == "__main__":
    key = jax.random.PRNGKey(0)
    k_emb, k_post, k_pairs = jax.random.split(key, 3)

    # Small shapes consistent with the module: N nodes, D-dim embeddings,
    # 2-class posterior matrix E (rows sum to 1), num_pairs sampled pairs.
    N, D = 64, 32
    embeddings = jax.random.normal(k_emb, (N, D), dtype=jnp.float32)
    E = jax.nn.softmax(jax.random.normal(k_post, (N, 2), dtype=jnp.float32), axis=-1)

    # Deterministic parameter init (module __init__: raw_margin = 0.5).
    raw_margin = jnp.asarray(0.5, dtype=jnp.float32)

    # Case 1: defaults (bf16 table, tile clamped by the pair count), both
    # core-halves + sentinel padding exercised.
    num_pairs = 200
    idx_i, idx_j = sample_pairs(k_pairs, E, num_pairs)
    loss = jax.block_until_ready(
        contrastive_pair_loss(embeddings, E, idx_i, idx_j, raw_margin))
    ref = reference_loss(embeddings, E, idx_i, idx_j, raw_margin)
    assert jnp.allclose(loss, ref, rtol=3e-2, atol=2e-3), (loss, ref)

    # Case 2: f32 table + small explicit tile — multi-step accumulation per
    # core-half with tighter numerics.
    num_pairs2 = 600
    idx_i2, idx_j2 = sample_pairs(jax.random.fold_in(k_pairs, 1), E, num_pairs2)
    loss2 = jax.block_until_ready(
        contrastive_pair_loss(embeddings, E, idx_i2, idx_j2, raw_margin,
                              tile=128, table_dtype=jnp.float32))
    ref2 = reference_loss(embeddings, E, idx_i2, idx_j2, raw_margin)
    assert jnp.allclose(loss2, ref2, rtol=1e-2, atol=1e-3), (loss2, ref2)

    # Case 3: enough pairs to hit the large default tile (2048 lanes / endpoint)
    # and multi-tile accumulation with heavy sentinel padding.
    num_pairs3 = 5000
    idx_i3, idx_j3 = sample_pairs(jax.random.fold_in(k_pairs, 2), E, num_pairs3)
    loss3 = jax.block_until_ready(
        contrastive_pair_loss(embeddings, E, idx_i3, idx_j3, raw_margin))
    ref3 = reference_loss(embeddings, E, idx_i3, idx_j3, raw_margin)
    assert jnp.allclose(loss3, ref3, rtol=3e-2, atol=2e-3), (loss3, ref3)

    print("KERNEL_OK")
</pallas_src>

<mosaic_0001>
module attributes {stable_mosaic.version = 11 : i64} {
  func.func @_pair_loss_kernel(%arg0: i32, %arg1: i32, %arg2: memref<1xf32, #tpu.memory_space<smem>>, %arg3: memref<40x128xbf16, #tpu.memory_space<vmem>>, %arg4: memref<1x256xi32, #tpu.memory_space<vmem>>, %arg5: memref<1x1x1xf32, #tpu.memory_space<vmem>>, %arg6: memref<1x128xf32, #tpu.memory_space<vmem>>) attributes {dimension_semantics = [#tpu.dimension_semantics<parallel>, #tpu.dimension_semantics<arbitrary>], iteration_bounds = array<i64: 2, 1>, scalar_prefetch = 0 : i64, scratch_operands = 1 : i64, tpu.core_type = #tpu.core_type<tc>, window_params = [{transform_indices = @transform_0, window_bounds = array<i64: 1>}, {pipeline_mode = #tpu.pipeline_mode<synchronous>, transform_indices = @transform_1, window_bounds = array<i64: 40, 128>}, {transform_indices = @transform_2, window_bounds = array<i64: 1, 256>}, {transform_indices = @transform_3, window_bounds = array<i64: 1, 1, 1>}]} {
    %c0_i32 = arith.constant 0 : i32
    %0 = arith.cmpi eq, %arg1, %c0_i32 : i32
    %1 = arith.extui %0 : i1 to i32
    %c0_i32_0 = arith.constant 0 : i32
    %2 = arith.cmpi ne, %1, %c0_i32_0 : i32
    scf.if %2 {
      %cst_19 = arith.constant 0.000000e+00 : f32
      %50 = vector.broadcast %cst_19 : f32 to vector<1x128xf32>
      %c0_20 = arith.constant 0 : index
      %c0_21 = arith.constant 0 : index
      %51 = vector.load %arg6[%c0_20, %c0_21] : memref<1x128xf32, #tpu.memory_space<vmem>>, vector<1x128xf32>
      tpu.vector_store %arg6[%c0_20, %c0_21], %50 {strides = array<i32>} : memref<1x128xf32, #tpu.memory_space<vmem>>, vector<1x128xf32>,
    } else {
    }
    %c0 = arith.constant 0 : index
    %c0_1 = arith.constant 0 : index
    %3 = vector.load %arg3[%c0, %c0_1] : memref<40x128xbf16, #tpu.memory_space<vmem>>, vector<40x128xbf16>
    %c0_2 = arith.constant 0 : index
    %c0_3 = arith.constant 0 : index
    %4 = vector.load %arg4[%c0_2, %c0_3] : memref<1x256xi32, #tpu.memory_space<vmem>>, vector<1x256xi32>
    %5 = tpu.iota {dimensions = array<i32: 0>} : vector<128x256xi32>
    %6 = vector.broadcast %4 : vector<1x256xi32> to vector<128x256xi32>
    %7 = arith.cmpi eq, %5, %6 : vector<128x256xi32>
    %cst = arith.constant 1.000000e+00 : f32
    %cst_4 = arith.constant 0.000000e+00 : f32
    %8 = vector.broadcast %cst : f32 to vector<128x256xf32>
    %9 = vector.broadcast %cst_4 : f32 to vector<128x256xf32>
    %10 = arith.select %7, %8, %9 : vector<128x256xi1>, vector<128x256xf32>
    %11 = arith.truncf %10 : vector<128x256xf32> to vector<128x256xbf16>
    %cst_5 = arith.constant dense<0.000000e+00> : vector<40x256xf32>
    %12 = tpu.matmul %3, %11, %cst_5 {dimension_numbers = #tpu.dot_dimension_numbers<[1], [0], [0], [1], [0, 0, 1, 1], [], []>} : vector<40x128xbf16>, vector<128x256xbf16>, vector<40x256xf32> -> vector<40x256xf32>
    %13 = vector.extract_strided_slice %12 {offsets = [0, 0], sizes = [40, 128], strides = [1, 1]} : vector<40x256xf32> to vector<40x128xf32>
    %14 = vector.extract_strided_slice %12 {offsets = [0, 128], sizes = [40, 128], strides = [1, 1]} : vector<40x256xf32> to vector<40x128xf32>
    %15 = arith.mulf %13, %14 : vector<40x128xf32>
    %16 = tpu.iota {dimensions = array<i32: 1>} : vector<1x40xi32>
    %c32_i32 = arith.constant 32 : i32
    %17 = vector.broadcast %c32_i32 : i32 to vector<1x40xi32>
    %18 = arith.cmpi slt, %16, %17 : vector<1x40xi32>
    %19 = arith.extui %18 : vector<1x40xi1> to vector<1x40xi32>
    %20 = arith.sitofp %19 : vector<1x40xi32> to vector<1x40xf32>
    %c32_i32_6 = arith.constant 32 : i32
    %21 = vector.broadcast %c32_i32_6 : i32 to vector<1x40xi32>
    %22 = arith.cmpi sge, %16, %21 : vector<1x40xi32>
    %c34_i32 = arith.constant 34 : i32
    %23 = vector.broadcast %c34_i32 : i32 to vector<1x40xi32>
    %24 = arith.cmpi slt, %16, %23 : vector<1x40xi32>
    %25 = arith.andi %22, %24 : vector<1x40xi1>
    %26 = arith.extui %25 : vector<1x40xi1> to vector<1x40xi32>
    %27 = arith.sitofp %26 : vector<1x40xi32> to vector<1x40xf32>
    %cst_7 = arith.constant dense<0.000000e+00> : vector<1x128xf32>
    %28 = tpu.matmul %20, %15, %cst_7 {dimension_numbers = #tpu.dot_dimension_numbers<[1], [0], [0], [1], [0, 0, 1, 1], [], []>} : vector<1x40xf32>, vector<40x128xf32>, vector<1x128xf32> -> vector<1x128xf32>
    %cst_8 = arith.constant dense<0.000000e+00> : vector<1x128xf32>
    %29 = tpu.matmul %27, %15, %cst_8 {dimension_numbers = #tpu.dot_dimension_numbers<[1], [0], [0], [1], [0, 0, 1, 1], [], []>} : vector<1x40xf32>, vector<40x128xf32>, vector<1x128xf32> -> vector<1x128xf32>
    %c0_9 = arith.constant 0 : index
    %30 = memref.load %arg2[%c0_9] : memref<1xf32, #tpu.memory_space<smem>>
    %cst_10 = arith.constant 1.000000e+00 : f32
    %31 = vector.broadcast %cst_10 : f32 to vector<1x128xf32>
    %32 = arith.subf %28, %31 : vector<1x128xf32>
    %33 = arith.mulf %32, %32 : vector<1x128xf32>
    %34 = vector.broadcast %30 : f32 to vector<1x128xf32>
    %35 = arith.subf %28, %34 : vector<1x128xf32>
    %cst_11 = arith.constant 0.000000e+00 : f32
    %36 = vector.broadcast %cst_11 : f32 to vector<1x128xf32>
    %37 = arith.maximumf %35, %36 : vector<1x128xf32>
    %38 = arith.mulf %37, %37 : vector<1x128xf32>
    %c0_12 = arith.constant 0 : index
    %c0_13 = arith.constant 0 : index
    %39 = vector.load %arg6[%c0_12, %c0_13] : memref<1x128xf32, #tpu.memory_space<vmem>>, vector<1x128xf32>
    %40 = arith.mulf %33, %29 : vector<1x128xf32>
    %cst_14 = arith.constant 1.000000e+00 : f32
    %41 = vector.broadcast %cst_14 : f32 to vector<1x128xf32>
    %42 = arith.subf %41, %29 : vector<1x128xf32>
    %43 = arith.mulf %38, %42 : vector<1x128xf32>
    %44 = arith.addf %40, %43 : vector<1x128xf32>
    %45 = arith.addf %39, %44 : vector<1x128xf32>
    %c0_15 = arith.constant 0 : index
    %c0_16 = arith.constant 0 : index
    %46 = vector.load %arg6[%c0_15, %c0_16] : memref<1x128xf32, #tpu.memory_space<vmem>>, vector<1x128xf32>
    tpu.vector_store %arg6[%c0_15, %c0_16], %45 {strides = array<i32>} : memref<1x128xf32, #tpu.memory_space<vmem>>, vector<1x128xf32>,
    %c0_i32_17 = arith.constant 0 : i32
    %47 = arith.cmpi eq, %arg1, %c0_i32_17 : i32
    %48 = arith.extui %47 : i1 to i32
    %c0_i32_18 = arith.constant 0 : i32
    %49 = arith.cmpi ne, %48, %c0_i32_18 : i32
    scf.if %49 {
      %c0_19 = arith.constant 0 : index
      %c0_20 = arith.constant 0 : index
      %50 = vector.load %arg6[%c0_19, %c0_20] : memref<1x128xf32, #tpu.memory_space<vmem>>, vector<1x128xf32>
      %cst_21 = arith.constant dense<0.000000e+00> : vector<1xf32>
      %51 = vector.multi_reduction <add>, %50, %cst_21 [1] : vector<1x128xf32> to vector<1xf32>
      %52 = vector.shape_cast %51 : vector<1xf32> to vector<1x1xf32>
      %53 = vector.shape_cast %52 : vector<1x1xf32> to vector<1x1x1xf32>
      %c0_22 = arith.constant 0 : index
      %c0_23 = arith.constant 0 : index
      %c0_24 = arith.constant 0 : index
      %54 = vector.load %arg5[%c0_22, %c0_23, %c0_24] : memref<1x1x1xf32, #tpu.memory_space<vmem>>, vector<1x1x1xf32>
      tpu.vector_store %arg5[%c0_22, %c0_23, %c0_24], %53 {strides = array<i32>} : memref<1x1x1xf32, #tpu.memory_space<vmem>>, vector<1x1x1xf32>,
    } else {
    }
    return
  }
  func.func @transform_0(%arg0: i32, %arg1: i32) -> i32 {
    %c0_i32 = arith.constant 0 : i32
    %c0_i32_0 = arith.constant 0 : i32
    return %c0_i32 : i32
  }
  func.func @transform_1(%arg0: i32, %arg1: i32) -> (i32, i32) {
    %c0_i32 = arith.constant 0 : i32
    %c0_i32_0 = arith.constant 0 : i32
    %c0_i32_1 = arith.constant 0 : i32
    return %c0_i32, %c0_i32_0 : i32, i32
  }
  func.func @transform_2(%arg0: i32, %arg1: i32) -> (i32, i32) {
    %c1_i32 = arith.constant 1 : i32
    %0 = arith.muli %arg0, %c1_i32 : i32
    %1 = arith.addi %0, %arg1 : i32
    %c0_i32 = arith.constant 0 : i32
    %c0_i32_0 = arith.constant 0 : i32
    return %c0_i32, %1 : i32, i32
  }
  func.func @transform_3(%arg0: i32, %arg1: i32) -> (i32, i32, i32) {
    %c0_i32 = arith.constant 0 : i32
    %c0_i32_0 = arith.constant 0 : i32
    %c0_i32_1 = arith.constant 0 : i32
    return %arg0, %c0_i32, %c0_i32_0 : i32, i32, i32
  }
}

</mosaic_0001>

<bundles_post_ra>
// kernel: tpu_custom_call.1
= control target key start
LH: loop header
LB: loop body
LE: loop exit
PB: predicated region body
PF: predicated region fallthrough
CT: control target
= control target key end

     0   :  { %s1189_s0 = inlined_call_operand.<no memory space> [shape: f32[1], index: 0, kind: input, shape index: {}]   ;;  %s1190_s1 = inlined_call_operand.hbm [shape: bf16[40,128], index: 1, kind: input, shape index: {}]   ;;  %s1191_s2 = inlined_call_operand.hbm [shape: s32[1,512], index: 2, kind: input, shape index: {}]   ;;  %s1192_s3 = inlined_call_operand.vmem [shape: f32[2,1,1], index: 3, kind: output, shape index: {}]  }
   0x1   :  { %8 = sst [smem:[#allocation3]] %s1189_s0 }
   0x2   :  { %9 = vsyncpa [#allocation5], 0 }
   0x3   :  { %10 = vsyncpa [#allocation7], 0 }
   0x4   :  { %12 = vsyncpa [#allocation7 + $0x1], 0  ;;  %s986_s14 = smov 0   ;;  %s988_s15 = smov 0  }
   0x5   :  { %s990_s16 = smov 0   ;;  %s992_s17 = smov 0  }
   0x6   :  { %s994_s18 = smov 0   ;;  %s996_s19 = smov 0  }
   0x7 LB: > { %s678_s0 = sadd.s32 4294967295, %s953_s19   ;;  %p94_p0 = scmp.ne.s32.totalorder %s937_s15, %s933_s14  ;;  %s953_s19 = sphi %s996_s19, %s18_s19   ;;  %s949_s18 = sphi %s994_s18, %s1202_s18   ;;  %s945_s17 = sphi %s992_s17, %s1201_s17   ;;  %s941_s16 = sphi %s990_s16, %s1200_s16   ;;  %s937_s15 = sphi %s988_s15, %s1199_s15   ;;  %s933_s14 = sphi %s986_s14, %s1198_s14  }
   0x8   : > { %p1016_p1 = scmp.eq.s32.totalorder %s678_s0, 0  ;;  %p680_p2 = scmp.ge.s32.totalorder %s953_s19, 1 }
   0x9   : > { %p131_p3 = scmp.lt.s32.totalorder %s953_s19, 3  ;;  %s955_s23 = smov [#allocation4]  }
   0xa   : > { %p1024_p4 = por %p1016_p1, %p94_p0  ;;  %s146_s24 = sshll.u32 %s955_s23, 4  ;;  %s147_s24 = int_to_ptr.vmem [resolvable:$true] %s146_s24 }
   0xb   : > { %p1028_p5 = pnand %p680_p2, %p131_p3  ;;  %s30_s26 = sadd.s32 1, %s949_s18 }
   0xc   : > { %s856_s27 = scalar_lea.vmem %s147_s24, 320  ;;  %p864_p12 = scmp.lt.s32.totalorder %s147_s24, %s147_s24 }
   0xd   : > { %p776_p6 = pneg %p1028_p5  ;;  %p857_p9 = scmp.ne.s32.totalorder %s147_s24, %s856_s27 }
   0xe   : > { %p865_p13 = scmp.lt.s32.totalorder %s856_s27, %s856_s27 }
   0xf   : > { %p1036_p7 = pnand %p776_p6, %p1016_p1 }
  0x10   : > { %p866_p0 = por %p865_p13, %p864_p12 }
  0x11   : > { %p847_p8 = pneg %p1036_p7 }
  0x13   : > { %p859_p10 = pnand %p857_p9, %p847_p8 }
  0x15   : > { %p860_p11 = pneg %p859_p10 }
  0x17   : > { %p867_p2 = pnand %p866_p0, %p860_p11 }
  0x19   : > { %870 = shalt.err (!%p867_p2)
}
  0x1a   : > { %s956_s28 = smov 64   ;;  %s957_s29 = smov 4  }
  0x1b   : > { %779 = dma.hbm_to_vmem [thread:$0]  (!%p1036_p7), %s1190_s1, 320, %s147_s24, [#allocation5], %s956_s28, %s956_s28, %s957_s29  }
  0x1c   : > { %p32_p3 = scmp.ge.s32.totalorder %s30_s26, 2  ;;  %s81_s5 = sadd.s32 1, %s941_s16 }
  0x1d   : > { %p88_p6 = scmp.ne.s32.totalorder %s941_s16, %s937_s15  ;;  %p89_p8 = scmp.eq.s32.totalorder %s953_s19, 0 }
  0x1e   : > { %s1204_s26 = smov (%p32_p3, %s30_s26), 0  ;;  %p785_p10 = scmp.lt.s32.totalorder %s953_s19, 2 }
  0x1f   : > { %p90_p9 = por %p89_p8, %p88_p6  ;;  %s78_s6 = ssub.s32 %s949_s18, %s1204_s26 }
  0x20   : > { %s160_s7 = sand.u32 1, %s941_s16   ;;  %p79_p11 = scmp.eq.s32.totalorder %s78_s6, 0 }
  0x21   : > { %s683_s8 = sshll.u32 %s160_s7, 1  ;;  %s731_s9 = sshll.u32 %s949_s18, 5 }
  0x22   : > { %s1060_s10 = scalar_select %p79_p11, %s941_s16, %s81_s5  }
  0x23   : > { %s171_s13 = scalar_lea.hbm %s1191_s2, %s731_s9  ;;  %s164_s14 = scalar_lea.vmem [#allocation6], %s683_s8 }
  0x24   : > { %s173_s0 = sshll.u32 %s164_s14, 4  ;;  %p1065_p7 = pnand %p785_p10, %p90_p9  ;;  %s174_s0 = int_to_ptr.vmem [resolvable:$true] %s173_s0 }
  0x25   : > { %s161_s24 = scalar_lea.sflag [#allocation7], %s160_s7  ;;  %s884_s25 = scalar_lea.vmem %s174_s0, 32 }
  0x26   : > { %p873_p12 = pneg %p1065_p7  ;;  %p885_p13 = scmp.ne.s32.totalorder %s174_s0, %s884_s25 }
  0x27   : > { %s958_s27 = smov [#allocation6]  }
  0x28   : > { %p887_p0 = pnand %p885_p13, %p873_p12  ;;  %s889_s28 = sshll.u32 %s958_s27, 4  ;;  %s890_s28 = int_to_ptr.vmem [resolvable:$false] %s889_s28 }
  0x29   : > { %s891_s29 = scalar_lea.vmem %s890_s28, 64  ;;  %p892_p3 = scmp.lt.s32.totalorder %s174_s0, %s890_s28 }
  0x2a   : > { %p888_p2 = pneg %p887_p0  ;;  %p893_p6 = scmp.lt.s32.totalorder %s891_s29, %s884_s25 }
  0x2c   : > { %p894_p8 = por %p893_p6, %p892_p3 }
  0x2e   : > { %p895_p9 = pnand %p894_p8, %p888_p2 }
  0x30   : > { %898 = shalt.err (!%p895_p9)
}
  0x31   : > { %783 = dma.hbm_to_vmem [thread:$0]  (!%p1065_p7), %s171_s13, 32, %s174_s0, %s161_s24  }
  0x32   : > { %182 = sbr.rel (%p1028_p5) target bundleno = 683 (0x2ab), region = 32 }
  0x37   : > { %924 = dma.done.wait (%p1016_p1), [#allocation5], 320  }
  0x38   : > { %926 = vsyncadd (%p1016_p1), [#allocation5], 4294966976  ;;  %s188_s30 = sand.u32 1, %s937_s15  }
  0x39   : > { %s688_s4 = sshll.u32 %s188_s30, 1  ;;  %s189_s5 = scalar_lea.sflag [#allocation7], %s188_s30 }
  0x3a   : > { %s192_s6 = scalar_lea.vmem [#allocation6], %s688_s4 }
  0x3b   : > { %928 = dma.done.wait (%p1024_p4), %s189_s5, 32  }
  0x3c   : > { %930 = vsyncadd (%p1024_p4), %s189_s5, 4294967264  ;;  %v230_v0 = vlaneseq  ;;  %v959_v1 = vmov 0   ;;  %v229_v7 = vld [vmem:[%s192_s6] sm:$0x3]  ;;  %v960_v14 = vmov 1.0|1.0  }
  0x3d   : > { %383 = vmatprep.mubr.bf16.mxu0 %v959_v1  ;;  %v842_v24 = vld [vmem:[#allocation4] sm:$0xff]   ;;  %v843_v25 = vld [vmem:[#allocation4 + $0x8] sm:$0xff]   ;;  %v844_v26 = vld [vmem:[#allocation4 + $0x10] ss:$0 sps:$4 sm:$0xff]   ;;  %v961_v27 = vmov 0.0   ;;  %s574_s20 = sld [smem:[#allocation3]] }
  0x3e   : > { %v1086_v2 = vshrl.u32 %v230_v0, 7  ;;  %744 = vmatprep.subr.mxu1 %v961_v27  ;;  %223 = vst [vmem:[#allocation2] sm:$0x1] %v961_v27  ;;  %v418_v40 = vand.u32 127, %v230_v0  ;;  %p215_p1 = scmp.lt.s32.totalorder %s945_s17, 1 }
  0x40   : > { %v253_v3 = vsub.s32 1, %v1086_v2  ;;  %v249_v4 = vsub.s32 0, %v1086_v2  ;;  %v245_v5 = vadd.s32 112, %v1086_v2  ;;  %v246_v6 = vadd.s32 120, %v1086_v2  ;;  %s1206_s17 = smov (!%p215_p1, %s945_s17), 1 }
  0x41   : > { %v243_v8 = vadd.s32 96, %v1086_v2  ;;  %v244_v9 = vadd.s32 104, %v1086_v2  ;;  %v241_v12 = vadd.s32 80, %v1086_v2  ;;  %v242_v13 = vadd.s32 88, %v1086_v2  ;;  %s217_s7 = scalar_lea.vmem %s1192_s3, %s1206_s17 }
  0x42   : > { %v1094_v10 = vrot.slane %v229_v7, %v253_v3  ;;  %v1096_v11 = vrot.slane %v229_v7, %v249_v4  ;;  %v239_v15 = vadd.s32 64, %v1086_v2  ;;  %v240_v16 = vadd.s32 72, %v1086_v2 }
  0x43   : > { %v237_v17 = vadd.s32 48, %v1086_v2  ;;  %v238_v18 = vadd.s32 56, %v1086_v2  ;;  %v235_v19 = vadd.s32 32, %v1086_v2  ;;  %v236_v20 = vadd.s32 40, %v1086_v2 }
  0x44   : > { %vm284_vm0 = vcmp.eq.s32.totalorder %v245_v5, %v1094_v10  ;;  %vm286_vm1 = vcmp.eq.s32.totalorder %v246_v6, %v1094_v10  ;;  %vm283_vm2 = vcmp.eq.s32.totalorder %v245_v5, %v1096_v11  ;;  %vm285_vm3 = vcmp.eq.s32.totalorder %v246_v6, %v1096_v11 }
  0x45   : > { %vm692_vm4 = vmpackc.low %vm286_vm1, %vm284_vm0  ;;  %vm280_vm5 = vcmp.eq.s32.totalorder %v243_v8, %v1094_v10  ;;  %vm282_vm6 = vcmp.eq.s32.totalorder %v244_v9, %v1094_v10  ;;  %vm279_vm7 = vcmp.eq.s32.totalorder %v243_v8, %v1096_v11  ;;  %vm281_vm8 = vcmp.eq.s32.totalorder %v244_v9, %v1096_v11  ;;  %v581_v61 = vld [vmem:[#allocation2] sm:$0x1] }
  0x46   : > { %693 = vmatprep.subr.msk.bf16.mxu0 %vm692_vm4, %v960_v14  ;;  %vm694_vm9 = vmpackc.low %vm285_vm3, %vm283_vm2  ;;  %vm276_vm10 = vcmp.eq.s32.totalorder %v241_v12, %v1094_v10  ;;  %vm278_vm11 = vcmp.eq.s32.totalorder %v242_v13, %v1094_v10  ;;  %vm275_vm15 = vcmp.eq.s32.totalorder %v241_v12, %v1096_v11  ;;  %vm277_vm0 = vcmp.eq.s32.totalorder %v242_v13, %v1096_v11 }
  0x47   : > { %695 = vmatpush1.bf16.msk.msra.mxu0 %vm694_vm9, %v960_v14  ;;  %vm696_vm12 = vmpackc.low %vm282_vm6, %vm280_vm5  ;;  %vm272_vm1 = vcmp.eq.s32.totalorder %v239_v15, %v1094_v10  ;;  %vm274_vm2 = vcmp.eq.s32.totalorder %v240_v16, %v1094_v10  ;;  %vm271_vm5 = vcmp.eq.s32.totalorder %v239_v15, %v1096_v11  ;;  %vm273_vm6 = vcmp.eq.s32.totalorder %v240_v16, %v1096_v11 }
  0x48   : > { %697 = vmatprep.subr.msk.bf16.mxu0 %vm696_vm12, %v960_v14  ;;  %vm698_vm13 = vmpackc.low %vm281_vm8, %vm279_vm7  ;;  %vm268_vm7 = vcmp.eq.s32.totalorder %v237_v17, %v1094_v10  ;;  %vm270_vm8 = vcmp.eq.s32.totalorder %v238_v18, %v1094_v10  ;;  %vm269_vm12 = vcmp.eq.s32.totalorder %v238_v18, %v1096_v11  ;;  %v233_v21 = vadd.s32 16, %v1086_v2 }
  0x49   : > { %vm700_vm14 = vmpackc.low %vm278_vm11, %vm276_vm10  ;;  %vm267_vm11 = vcmp.eq.s32.totalorder %v237_v17, %v1096_v11  ;;  %v234_v22 = vadd.s32 24, %v1086_v2  ;;  %v232_v23 = vadd.s32 8, %v1086_v2  ;;  %v577_v49 = vstv %s574_s20 }
  0x4a   : > { %vm702_vm3 = vmpackc.low %vm277_vm0, %vm275_vm15 }
  0x4b   : > { %699 = vmatpush1.bf16.msk.msra.mxu0 %vm698_vm13, %v960_v14  ;;  %vm704_vm4 = vmpackc.low %vm274_vm2, %vm272_vm1  ;;  %vm264_vm13 = vcmp.eq.s32.totalorder %v235_v19, %v1094_v10  ;;  %vm263_vm1 = vcmp.eq.s32.totalorder %v235_v19, %v1096_v11  ;;  %vm265_vm2 = vcmp.eq.s32.totalorder %v236_v20, %v1096_v11 }
  0x4c   : > { %701 = vmatprep.subr.msk.bf16.mxu0 %vm700_vm14, %v960_v14  ;;  %vm706_vm9 = vmpackc.low %vm273_vm6, %vm271_vm5  ;;  %vm266_vm14 = vcmp.eq.s32.totalorder %v236_v20, %v1094_v10 }
  0x4d   : > { %vm708_vm10 = vmpackc.low %vm270_vm8, %vm268_vm7  ;;  %vm259_vm7 = vcmp.eq.s32.totalorder %v233_v21, %v1096_v11  ;;  %vm261_vm8 = vcmp.eq.s32.totalorder %v234_v22, %v1096_v11 }
  0x4e   : > { %vm710_vm15 = vmpackc.low %vm269_vm12, %vm267_vm11 }
  0x4f   : > { %703 = vmatpush1.bf16.msk.msra.mxu0 %vm702_vm3, %v960_v14  ;;  %vm712_vm0 = vmpackc.low %vm266_vm14, %vm264_vm13  ;;  %vm260_vm3 = vcmp.eq.s32.totalorder %v233_v21, %v1094_v10  ;;  %vm255_vm13 = vcmp.eq.s32.totalorder %v1086_v2, %v1096_v11  ;;  %vm257_vm14 = vcmp.eq.s32.totalorder %v232_v23, %v1096_v11 }
  0x50   : > { %705 = vmatprep.subr.msk.bf16.mxu0 %vm704_vm4, %v960_v14  ;;  %vm262_vm4 = vcmp.eq.s32.totalorder %v234_v22, %v1094_v10  ;;  %vm714_vm5 = vmpackc.low %vm265_vm2, %vm263_vm1  ;;  %vm419_vm1 = vcmp.lt.s32.totalorder %v418_v40, 32  ;;  %vm427_vm2 = vcmask 326656  }
  0x51   : > { %vm716_vm6 = vmpackc.low %vm262_vm4, %vm260_vm3  ;;  %v724_v46 = vsel %vm419_vm1, 1.0, %v961_v27  ;;  %vm422_vm3 = vcmp.ge.s32.totalorder %v418_v40, 32  ;;  %vm423_vm4 = vcmp.lt.s32.totalorder %v418_v40, 34 }
  0x52   : > { %vm718_vm11 = vmpackc.low %vm261_vm8, %vm259_vm7  ;;  %vm596_vm7 = vcmask 0  }
  0x53   : > { %707 = vmatpush1.bf16.msk.msra.mxu0 %vm706_vm9, %v960_v14  ;;  %vm256_vm9 = vcmp.eq.s32.totalorder %v1086_v2, %v1094_v10 }
  0x54   : > { %709 = vmatprep.subr.msk.bf16.mxu0 %vm708_vm10, %v960_v14  ;;  %vm258_vm10 = vcmp.eq.s32.totalorder %v232_v23, %v1094_v10 }
  0x55   : > { %vm720_vm12 = vmpackc.low %vm258_vm10, %vm256_vm9 }
  0x57   : > { %711 = vmatpush1.bf16.msk.msra.mxu0 %vm710_vm15, %v960_v14  ;;  %vm722_vm15 = vmpackc.low %vm257_vm14, %vm255_vm13 }
  0x58   : > { %713 = vmatprep.subr.msk.bf16.mxu0 %vm712_vm0, %v960_v14  ;;  %vm962_vm0 = vmmov 0  }
  0x59   : > { %754 = vmatprep.mubr.msk.f32.mxu1 %vm962_vm0, %v961_v27 }
  0x5b   : > { %715 = vmatpush1.bf16.msk.msra.mxu0 %vm714_vm5, %v960_v14  ;;  %vm424_vm5 = vmand %vm422_vm3, %vm423_vm4 }
  0x5c   : > { %717 = vmatprep.subr.msk.bf16.mxu0 %vm716_vm6, %v960_v14  ;;  %v725_v47 = vsel %vm424_vm5, 1.0, %v961_v27  ;;  %vm592_vm6 = vcmask 1040384  }
  0x5f   : > { %719 = vmatpush1.bf16.msk.msra.mxu0 %vm718_vm11, %v960_v14 }
  0x60   : > { %721 = vmatprep.subr.msk.bf16.mxu0 %vm720_vm12, %v960_v14 }
  0x63   : > { %723 = vmatpush1.bf16.msk.msra.mxu0 %vm722_vm15, %v960_v14 }
  0x66   : > { %384 = vmatmul.mubr.bf16.vlgmr.msra.gmra.mxu0 %v842_v24 }
  0x67   : > { %393 = vmatprep.mubr.bf16.mxu0 %v959_v1 }
  0x6e   : > { %394 = vmatmul.mubr.bf16.gmra.mxu0 %v843_v25 }
  0x6f   : > { %403 = vmatprep.mubr.bf16.mxu0 %v959_v1 }
  0x76   : > { %404 = vmatmul.mubr.bf16.gmra.mxu0 %v844_v26 }
 0x126   : > { %v385_v28 = vpop.f32.mrf.mxu0 }
 0x128   : > { %v387_v29 = vpop.f32.mrf.mxu0 }
 0x129   : > { %v412_v45 = vmul.f32 %v387_v29, %v385_v28 }
 0x12a   : > { %v389_v30 = vpop.f32.mrf.mxu0 }
 0x12c   : > { %v391_v31 = vpop.f32.mrf.mxu0 }
 0x12d   : > { %v413_v44 = vmul.f32 %v391_v31, %v389_v30 }
 0x12e   : > { %v395_v32 = vpop.f32.mrf.mxu0 }
 0x130   : > { %v397_v33 = vpop.f32.mrf.mxu0 }
 0x131   : > { %v414_v43 = vmul.f32 %v397_v33, %v395_v32 }
 0x132   : > { %v399_v34 = vpop.f32.mrf.mxu0 }
 0x134   : > { %v401_v35 = vpop.f32.mrf.mxu0 }
 0x135   : > { %v415_v41 = vmul.f32 %v401_v35, %v399_v34 }
 0x136   : > { %v405_v36 = vpop.f32.mrf.mxu0 }
 0x138   : > { %v407_v37 = vpop.f32.mrf.mxu0 }
 0x139   : > { %v416_v38 = vmul.f32 %v407_v37, %v405_v36 }
 0x13a   : > { %v409_v39 = vpop.f32.mrf.mxu0 }
 0x13b   : > { %745 = vmatpush3.msra.mxu1 %v416_v38 }
 0x13c   : > { %v410_v42 = vpop.f32.mrf.mxu0  ;;  %746 = vmatprep.subr.mxu1 %v961_v27 }
 0x13d   : > { %747 = vmatpush3.msra.mxu1 %v415_v41 }
 0x13e   : > { %748 = vmatprep.subr.mxu1 %v961_v27 }
 0x13f   : > { %749 = vmatpush3.msra.mxu1 %v414_v43 }
 0x140   : > { %750 = vmatprep.subr.mxu1 %v961_v27 }
 0x141   : > { %751 = vmatpush3.msra.mxu1 %v413_v44 }
 0x142   : > { %752 = vmatprep.subr.mxu1 %v961_v27 }
 0x143   : > { %753 = vmatpush3.msra.mxu1 %v412_v45 }
 0x144   : > { %755 = vmatmul.mubr.msk.f32.vlgmr.msra.gmra.mxu1 %vm427_vm2, %v724_v46  ;;  %757 = vmatprep.subr.mxu1 %v961_v27 }
 0x145   : > { %758 = vmatpush3.msra.mxu1 %v416_v38  ;;  %767 = vmatprep.mubr.msk.f32.mxu1 %vm962_vm0, %v961_v27 }
 0x146   : > { %759 = vmatprep.subr.mxu1 %v961_v27 }
 0x147   : > { %760 = vmatpush3.msra.mxu1 %v415_v41 }
 0x148   : > { %761 = vmatprep.subr.mxu1 %v961_v27 }
 0x149   : > { %762 = vmatpush3.msra.mxu1 %v414_v43 }
 0x14a   : > { %763 = vmatprep.subr.mxu1 %v961_v27 }
 0x14b   : > { %764 = vmatpush3.msra.mxu1 %v413_v44 }
 0x14c   : > { %765 = vmatprep.subr.mxu1 %v961_v27 }
 0x14d   : > { %766 = vmatpush3.msra.mxu1 %v412_v45 }
 0x14e   : > { %768 = vmatmul.mubr.msk.f32.vlgmr.msra.gmra.mxu1 %vm427_vm2, %v725_v47 }
 0x204   : > { %v497_v48 = vpop.f32.mrf.mxu1 }
 0x205   : > { %v578_v51 = vsub.f32 %v497_v48, %v577_v49  ;;  %v728_v52 = vadd.f32 -1.0, %v497_v48 }
 0x206   : > { %v756_v50 = vpop.f32.mrf.mxu1 }
 0x207   : > { %v579_v53 = vmax.f32 %v578_v51, 0.0  ;;  %v576_v55 = vmul.f32 %v728_v52, %v728_v52 }
 0x209   : > { %v580_v56 = vmul.f32 %v579_v53, %v579_v53 }
 0x20e   : > { %v570_v54 = vpop.f32.mrf.mxu1 }
 0x20f   : > { %v583_v57 = vsub.f32 1.0, %v570_v54  ;;  %v582_v59 = vmul.f32 %v576_v55, %v570_v54 }
 0x210   : > { %v769_v58 = vpop.f32.mrf.mxu1 }
 0x211   : > { %v584_v60 = vmul.f32 %v583_v57, %v580_v56 }
 0x213   : > { %v585_v62 = vadd.f32 %v584_v60, %v582_v59 }
 0x215   : > { %v586_v63 = vadd.f32 %v585_v62, %v581_v61 }
 0x217   : > { %587 = vst [vmem:[#allocation2] sm:$0x1] %v586_v63 }
 0x21e   : > { %v591_v0 = vld [vmem:[#allocation2] sm:$0x1] }
 0x21f   : > { %v593_v1 = vsel %vm592_vm6, %v591_v0, 0.0 }
 0x220   : > { %594 = vadd.xlane.f32.xlu0 %v593_v1 }
 0x2a9   : > { %v595_v2 = vpop.xlane.xlu0 %594 }
 0x2aa   : > { %597 = vst.msk [vmem:[%s217_s7] sm:$0x1] %vm596_vm7, %v595_v2 }
 0x2ab PF: > { %s18_s19 = sadd.s32 1, %s953_s19   ;;  %s1198_s14 = smov %s937_s15 }
 0x2ac   : > { %p15_p4 = scmp.ge.s32.totalorder %s18_s19, 4   ;;  %s1199_s15 = smov %s941_s16 }
 0x2ad   : > { %s1200_s16 = smov %s1060_s10  ;;  %s1201_s17 = smov %s949_s18 }
 0x2ae   : > { %s1202_s18 = smov %s1204_s26  ;;  %17 = sbr.rel (!%p15_p4) target bundleno = 7 (0x7), region = 85 }
 0x2b3   :  { %615 = vsyncpa [#allocation5], 1 }
 0x2b4   :  { %617 = vsyncpa [#allocation5 + $0x1], 1 }
 0x2b5   :  { %618 = vsyncpa [#allocation7], 1 }
 0x2b6   :  { %620 = vsyncpa [#allocation7 + $0x1], 1 }

</bundles_post_ra>
